<compile_context>
chip_gen: v7x
topology: tpu7x:2x2x1
jax: 0.10.0
libtpu: 0.0.40
codegen_flags: <defaults>
</compile_context>

<pallas_src>
import jax
import jax.numpy as jnp
from jax.experimental import pallas as pl
from jax.experimental.pallas import tpu as pltpu

IN_FEATURES = 8              # diabetes.csv has 8 feature columns (label excluded)
HIDDEN = (512, 256, 128, 64)
OUT_FEATURES = 2

TILE_B_MAX = 1024            # batch tile (M) — the only free MXU dim to fill


def _round_up(x, m):
    return (x + m - 1) // m * m


def _mlp_kernel(x_ref,
                w1_ref, b1_ref,
                w2_ref, b2_ref,
                w3_ref, b3_ref,
                w4_ref, b4_ref,
                w5_ref, b5_ref,
                o_ref):
    """One batch tile of the fused 5-layer MLP. Weights are VMEM-resident bf16."""

    def hidden_layer(h, w_ref, b_ref):
        # bf16 operands into the MXU, f32 accumulation; bias-add + ReLU in bf16
        # (packed VALU on v6e/v7x) feeding the next matmul with no extra cast.
        acc = jnp.dot(h, w_ref[...], preferred_element_type=jnp.float32)
        return jnp.maximum(acc.astype(jnp.bfloat16) + b_ref[...], 0.0)

    h = x_ref[...]                           # (tile_b, 8)   bf16
    h = hidden_layer(h, w1_ref, b1_ref)      # (tile_b, 512) bf16
    h = hidden_layer(h, w2_ref, b2_ref)      # (tile_b, 256) bf16
    h = hidden_layer(h, w3_ref, b3_ref)      # (tile_b, 128) bf16
    h = hidden_layer(h, w4_ref, b4_ref)      # (tile_b, 64)  bf16
    # Final layer: f32 accumulate + f32 bias, narrow (2-wide) f32 store.
    out = jnp.dot(h, w5_ref[...], preferred_element_type=jnp.float32) + b5_ref[...]
    o_ref[...] = out


def init_params(key):
    """Deterministic init mirroring torch.nn.Linear (uniform ±1/sqrt(fan_in)).

    Weights are stored transposed vs. PyTorch, i.e. (in_features, out_features).
    """
    dims = (IN_FEATURES,) + HIDDEN + (OUT_FEATURES,)
    params = []
    for i in range(len(dims) - 1):
        fan_in, fan_out = dims[i], dims[i + 1]
        key, kw, kb = jax.random.split(key, 3)
        bound = 1.0 / jnp.sqrt(jnp.float32(fan_in))
        w = jax.random.uniform(kw, (fan_in, fan_out), jnp.float32, -bound, bound)
        b = jax.random.uniform(kb, (1, fan_out), jnp.float32, -bound, bound)
        params.append((w, b))
    return params


def prepare_params(params):
    """Cast weights (and hidden-layer biases) to bf16 once, offline. No padding."""
    n = len(params)
    prepped = []
    for i, (w, b) in enumerate(params):
        w = w.astype(jnp.bfloat16)
        if i < n - 1:
            b = b.astype(jnp.bfloat16)   # bf16 epilogue for hidden layers
        prepped.append((w, b))
    return prepped


@jax.jit
def net_forward(x, prepped_params):
    """x: (B, IN_FEATURES) f32.  prepped_params: output of prepare_params."""
    B = x.shape[0]
    b_ceil = _round_up(B, 8)
    if b_ceil >= 16:
        # Guarantee >= 2 grid steps when the batch allows, so v7x megacore can
        # shard the ("parallel",) grid axis across both TensorCores.
        tile_b = min(TILE_B_MAX, _round_up((b_ceil + 1) // 2, 8))
    else:
        tile_b = b_ceil
    b_pad = _round_up(b_ceil, tile_b)
    grid = (b_pad // tile_b,)

    # Input streamed at its real 8-lane width in bf16; only a cheap bf16 row
    # pad when B isn't a tile multiple (no 8->128 lane pad in HBM).
    x_in = x.astype(jnp.bfloat16)
    if b_pad != B:
        x_in = jnp.pad(x_in, ((0, b_pad - B), (0, 0)))

    flat = []
    for w, b in prepped_params:
        flat.extend([w, b])

    # x / out blocks walk the batch; weights/biases use a constant index_map
    # (same block every step -> stay resident in VMEM; total < 1 MiB so the
    # default scoped VMEM is ample on v5e/v6e/v7x even at tile_b = 1024).
    in_specs = [pl.BlockSpec((tile_b, IN_FEATURES), lambda i: (i, 0))]
    for a in flat:
        in_specs.append(pl.BlockSpec(a.shape, lambda i: (0, 0)))
    out_spec = pl.BlockSpec((tile_b, OUT_FEATURES), lambda i: (i, 0))

    flops = 2 * B * (IN_FEATURES * HIDDEN[0] + HIDDEN[0] * HIDDEN[1]
                     + HIDDEN[1] * HIDDEN[2] + HIDDEN[2] * HIDDEN[3]
                     + HIDDEN[3] * OUT_FEATURES)
    bytes_accessed = (sum(int(a.size) * a.dtype.itemsize for a in flat)
                      + int(x_in.size) * x_in.dtype.itemsize
                      + b_pad * OUT_FEATURES * 4)

    out = pl.pallas_call(
        _mlp_kernel,
        out_shape=jax.ShapeDtypeStruct((b_pad, OUT_FEATURES), jnp.float32),
        grid_spec=pltpu.PrefetchScalarGridSpec(
            num_scalar_prefetch=0,
            grid=grid,
            in_specs=in_specs,
            out_specs=out_spec,
        ),
        compiler_params=pltpu.CompilerParams(
            dimension_semantics=("parallel",),
        ),
        cost_estimate=pl.CostEstimate(
            flops=flops, transcendentals=0, bytes_accessed=bytes_accessed),
    )(x_in, *flat)

    if b_pad != B:
        out = out[:B]
    return out


def reference_forward(x, prepped_params):
    """Pure-JAX reference matching the kernel numerics (bf16 dots/epilogue, f32 acc)."""
    h = x.astype(jnp.bfloat16)
    n = len(prepped_params)
    out = None
    for i, (w, b) in enumerate(prepped_params):
        acc = jnp.dot(h, w, preferred_element_type=jnp.float32)
        if i < n - 1:
            h = jnp.maximum(acc.astype(jnp.bfloat16) + b, 0.0)
        else:
            out = acc + b
    return out


if __name__ == "__main__":
    key = jax.random.PRNGKey(0)
    key, kx = jax.random.split(key)

    batch = 8
    x = jax.random.normal(kx, (batch, IN_FEATURES), dtype=jnp.float32)
    params = init_params(key)
    prepped = prepare_params(params)

    out = jax.block_until_ready(net_forward(x, prepped))
    ref = reference_forward(x, prepped)

    assert out.shape == (batch, OUT_FEATURES)
    assert jnp.allclose(out, ref, atol=1e-2, rtol=1e-2)

    print("KERNEL_OK")
</pallas_src>

<mosaic_0001>
module attributes {stable_mosaic.version = 11 : i64} {
  func.func @_mlp_kernel(%arg0: i32, %arg1: memref<8x8xbf16, #tpu.memory_space<vmem>>, %arg2: memref<8x512xbf16, #tpu.memory_space<vmem>>, %arg3: memref<1x512xbf16, #tpu.memory_space<vmem>>, %arg4: memref<512x256xbf16, #tpu.memory_space<vmem>>, %arg5: memref<1x256xbf16, #tpu.memory_space<vmem>>, %arg6: memref<256x128xbf16, #tpu.memory_space<vmem>>, %arg7: memref<1x128xbf16, #tpu.memory_space<vmem>>, %arg8: memref<128x64xbf16, #tpu.memory_space<vmem>>, %arg9: memref<1x64xbf16, #tpu.memory_space<vmem>>, %arg10: memref<64x2xbf16, #tpu.memory_space<vmem>>, %arg11: memref<1x2xf32, #tpu.memory_space<vmem>>, %arg12: memref<8x2xf32, #tpu.memory_space<vmem>>) attributes {dimension_semantics = [#tpu.dimension_semantics<parallel>], iteration_bounds = array<i64: 1>, scalar_prefetch = 0 : i64, scratch_operands = 0 : i64, tpu.core_type = #tpu.core_type<tc>, window_params = [{transform_indices = @transform_0, window_bounds = array<i64: 8, 8>}, {pipeline_mode = #tpu.pipeline_mode<synchronous>, transform_indices = @transform_1, window_bounds = array<i64: 8, 512>}, {pipeline_mode = #tpu.pipeline_mode<synchronous>, transform_indices = @transform_2, window_bounds = array<i64: 1, 512>}, {pipeline_mode = #tpu.pipeline_mode<synchronous>, transform_indices = @transform_3, window_bounds = array<i64: 512, 256>}, {pipeline_mode = #tpu.pipeline_mode<synchronous>, transform_indices = @transform_4, window_bounds = array<i64: 1, 256>}, {pipeline_mode = #tpu.pipeline_mode<synchronous>, transform_indices = @transform_5, window_bounds = array<i64: 256, 128>}, {pipeline_mode = #tpu.pipeline_mode<synchronous>, transform_indices = @transform_6, window_bounds = array<i64: 1, 128>}, {pipeline_mode = #tpu.pipeline_mode<synchronous>, transform_indices = @transform_7, window_bounds = array<i64: 128, 64>}, {pipeline_mode = #tpu.pipeline_mode<synchronous>, transform_indices = @transform_8, window_bounds = array<i64: 1, 64>}, {pipeline_mode = #tpu.pipeline_mode<synchronous>, transform_indices = @transform_9, window_bounds = array<i64: 64, 2>}, {pipeline_mode = #tpu.pipeline_mode<synchronous>, transform_indices = @transform_10, window_bounds = array<i64: 1, 2>}, {transform_indices = @transform_11, window_bounds = array<i64: 8, 2>}]} {
    %c0 = arith.constant 0 : index
    %c0_0 = arith.constant 0 : index
    %0 = vector.load %arg1[%c0, %c0_0] : memref<8x8xbf16, #tpu.memory_space<vmem>>, vector<8x8xbf16>
    %c0_1 = arith.constant 0 : index
    %c0_2 = arith.constant 0 : index
    %1 = vector.load %arg2[%c0_1, %c0_2] : memref<8x512xbf16, #tpu.memory_space<vmem>>, vector<8x512xbf16>
    %cst = arith.constant dense<0.000000e+00> : vector<8x512xf32>
    %2 = tpu.matmul %0, %1, %cst {dimension_numbers = #tpu.dot_dimension_numbers<[1], [0], [0], [1], [0, 0, 1, 1], [], []>} : vector<8x8xbf16>, vector<8x512xbf16>, vector<8x512xf32> -> vector<8x512xf32>
    %3 = arith.truncf %2 : vector<8x512xf32> to vector<8x512xbf16>
    %c0_3 = arith.constant 0 : index
    %c0_4 = arith.constant 0 : index
    %4 = vector.load %arg3[%c0_3, %c0_4] : memref<1x512xbf16, #tpu.memory_space<vmem>>, vector<1x512xbf16>
    %5 = vector.broadcast %4 : vector<1x512xbf16> to vector<8x512xbf16>
    %6 = arith.addf %3, %5 : vector<8x512xbf16>
    %cst_5 = arith.constant 0.000000e+00 : bf16
    %7 = vector.broadcast %cst_5 : bf16 to vector<8x512xbf16>
    %8 = arith.maximumf %6, %7 : vector<8x512xbf16>
    %c0_6 = arith.constant 0 : index
    %c0_7 = arith.constant 0 : index
    %9 = vector.load %arg4[%c0_6, %c0_7] : memref<512x256xbf16, #tpu.memory_space<vmem>>, vector<512x256xbf16>
    %cst_8 = arith.constant dense<0.000000e+00> : vector<8x256xf32>
    %10 = tpu.matmul %8, %9, %cst_8 {dimension_numbers = #tpu.dot_dimension_numbers<[1], [0], [0], [1], [0, 0, 1, 1], [], []>} : vector<8x512xbf16>, vector<512x256xbf16>, vector<8x256xf32> -> vector<8x256xf32>
    %11 = arith.truncf %10 : vector<8x256xf32> to vector<8x256xbf16>
    %c0_9 = arith.constant 0 : index
    %c0_10 = arith.constant 0 : index
    %12 = vector.load %arg5[%c0_9, %c0_10] : memref<1x256xbf16, #tpu.memory_space<vmem>>, vector<1x256xbf16>
    %13 = vector.broadcast %12 : vector<1x256xbf16> to vector<8x256xbf16>
    %14 = arith.addf %11, %13 : vector<8x256xbf16>
    %cst_11 = arith.constant 0.000000e+00 : bf16
    %15 = vector.broadcast %cst_11 : bf16 to vector<8x256xbf16>
    %16 = arith.maximumf %14, %15 : vector<8x256xbf16>
    %c0_12 = arith.constant 0 : index
    %c0_13 = arith.constant 0 : index
    %17 = vector.load %arg6[%c0_12, %c0_13] : memref<256x128xbf16, #tpu.memory_space<vmem>>, vector<256x128xbf16>
    %cst_14 = arith.constant dense<0.000000e+00> : vector<8x128xf32>
    %18 = tpu.matmul %16, %17, %cst_14 {dimension_numbers = #tpu.dot_dimension_numbers<[1], [0], [0], [1], [0, 0, 1, 1], [], []>} : vector<8x256xbf16>, vector<256x128xbf16>, vector<8x128xf32> -> vector<8x128xf32>
    %19 = arith.truncf %18 : vector<8x128xf32> to vector<8x128xbf16>
    %c0_15 = arith.constant 0 : index
    %c0_16 = arith.constant 0 : index
    %20 = vector.load %arg7[%c0_15, %c0_16] : memref<1x128xbf16, #tpu.memory_space<vmem>>, vector<1x128xbf16>
    %21 = vector.broadcast %20 : vector<1x128xbf16> to vector<8x128xbf16>
    %22 = arith.addf %19, %21 : vector<8x128xbf16>
    %cst_17 = arith.constant 0.000000e+00 : bf16
    %23 = vector.broadcast %cst_17 : bf16 to vector<8x128xbf16>
    %24 = arith.maximumf %22, %23 : vector<8x128xbf16>
    %c0_18 = arith.constant 0 : index
    %c0_19 = arith.constant 0 : index
    %25 = vector.load %arg8[%c0_18, %c0_19] : memref<128x64xbf16, #tpu.memory_space<vmem>>, vector<128x64xbf16>
    %cst_20 = arith.constant dense<0.000000e+00> : vector<8x64xf32>
    %26 = tpu.matmul %24, %25, %cst_20 {dimension_numbers = #tpu.dot_dimension_numbers<[1], [0], [0], [1], [0, 0, 1, 1], [], []>} : vector<8x128xbf16>, vector<128x64xbf16>, vector<8x64xf32> -> vector<8x64xf32>
    %27 = arith.truncf %26 : vector<8x64xf32> to vector<8x64xbf16>
    %c0_21 = arith.constant 0 : index
    %c0_22 = arith.constant 0 : index
    %28 = vector.load %arg9[%c0_21, %c0_22] : memref<1x64xbf16, #tpu.memory_space<vmem>>, vector<1x64xbf16>
    %29 = vector.broadcast %28 : vector<1x64xbf16> to vector<8x64xbf16>
    %30 = arith.addf %27, %29 : vector<8x64xbf16>
    %cst_23 = arith.constant 0.000000e+00 : bf16
    %31 = vector.broadcast %cst_23 : bf16 to vector<8x64xbf16>
    %32 = arith.maximumf %30, %31 : vector<8x64xbf16>
    %c0_24 = arith.constant 0 : index
    %c0_25 = arith.constant 0 : index
    %33 = vector.load %arg10[%c0_24, %c0_25] : memref<64x2xbf16, #tpu.memory_space<vmem>>, vector<64x2xbf16>
    %cst_26 = arith.constant dense<0.000000e+00> : vector<8x2xf32>
    %34 = tpu.matmul %32, %33, %cst_26 {dimension_numbers = #tpu.dot_dimension_numbers<[1], [0], [0], [1], [0, 0, 1, 1], [], []>} : vector<8x64xbf16>, vector<64x2xbf16>, vector<8x2xf32> -> vector<8x2xf32>
    %c0_27 = arith.constant 0 : index
    %c0_28 = arith.constant 0 : index
    %35 = vector.load %arg11[%c0_27, %c0_28] : memref<1x2xf32, #tpu.memory_space<vmem>>, vector<1x2xf32>
    %36 = vector.broadcast %35 : vector<1x2xf32> to vector<8x2xf32>
    %37 = arith.addf %34, %36 : vector<8x2xf32>
    %c0_29 = arith.constant 0 : index
    %c0_30 = arith.constant 0 : index
    %38 = vector.load %arg12[%c0_29, %c0_30] : memref<8x2xf32, #tpu.memory_space<vmem>>, vector<8x2xf32>
    tpu.vector_store %arg12[%c0_29, %c0_30], %37 {strides = array<i32>} : memref<8x2xf32, #tpu.memory_space<vmem>>, vector<8x2xf32>,
    return
  }
  func.func @transform_0(%arg0: i32) -> (i32, i32) {
    %c0_i32 = arith.constant 0 : i32
    %c0_i32_0 = arith.constant 0 : i32
    return %arg0, %c0_i32 : i32, i32
  }
  func.func @transform_1(%arg0: i32) -> (i32, i32) {
    %c0_i32 = arith.constant 0 : i32
    %c0_i32_0 = arith.constant 0 : i32
    %c0_i32_1 = arith.constant 0 : i32
    return %c0_i32, %c0_i32_0 : i32, i32
  }
  func.func @transform_2(%arg0: i32) -> (i32, i32) {
    %c0_i32 = arith.constant 0 : i32
    %c0_i32_0 = arith.constant 0 : i32
    %c0_i32_1 = arith.constant 0 : i32
    return %c0_i32, %c0_i32_0 : i32, i32
  }
  func.func @transform_3(%arg0: i32) -> (i32, i32) {
    %c0_i32 = arith.constant 0 : i32
    %c0_i32_0 = arith.constant 0 : i32
    %c0_i32_1 = arith.constant 0 : i32
    return %c0_i32, %c0_i32_0 : i32, i32
  }
  func.func @transform_4(%arg0: i32) -> (i32, i32) {
    %c0_i32 = arith.constant 0 : i32
    %c0_i32_0 = arith.constant 0 : i32
    %c0_i32_1 = arith.constant 0 : i32
    return %c0_i32, %c0_i32_0 : i32, i32
  }
  func.func @transform_5(%arg0: i32) -> (i32, i32) {
    %c0_i32 = arith.constant 0 : i32
    %c0_i32_0 = arith.constant 0 : i32
    %c0_i32_1 = arith.constant 0 : i32
    return %c0_i32, %c0_i32_0 : i32, i32
  }
  func.func @transform_6(%arg0: i32) -> (i32, i32) {
    %c0_i32 = arith.constant 0 : i32
    %c0_i32_0 = arith.constant 0 : i32
    %c0_i32_1 = arith.constant 0 : i32
    return %c0_i32, %c0_i32_0 : i32, i32
  }
  func.func @transform_7(%arg0: i32) -> (i32, i32) {
    %c0_i32 = arith.constant 0 : i32
    %c0_i32_0 = arith.constant 0 : i32
    %c0_i32_1 = arith.constant 0 : i32
    return %c0_i32, %c0_i32_0 : i32, i32
  }
  func.func @transform_8(%arg0: i32) -> (i32, i32) {
    %c0_i32 = arith.constant 0 : i32
    %c0_i32_0 = arith.constant 0 : i32
    %c0_i32_1 = arith.constant 0 : i32
    return %c0_i32, %c0_i32_0 : i32, i32
  }
  func.func @transform_9(%arg0: i32) -> (i32, i32) {
    %c0_i32 = arith.constant 0 : i32
    %c0_i32_0 = arith.constant 0 : i32
    %c0_i32_1 = arith.constant 0 : i32
    return %c0_i32, %c0_i32_0 : i32, i32
  }
  func.func @transform_10(%arg0: i32) -> (i32, i32) {
    %c0_i32 = arith.constant 0 : i32
    %c0_i32_0 = arith.constant 0 : i32
    %c0_i32_1 = arith.constant 0 : i32
    return %c0_i32, %c0_i32_0 : i32, i32
  }
  func.func @transform_11(%arg0: i32) -> (i32, i32) {
    %c0_i32 = arith.constant 0 : i32
    %c0_i32_0 = arith.constant 0 : i32
    return %arg0, %c0_i32 : i32, i32
  }
}

</mosaic_0001>

<bundles_post_ra>
// kernel: net_forward.1
= control target key start
LH: loop header
LB: loop body
LE: loop exit
PB: predicated region body
PF: predicated region fallthrough
CT: control target
= control target key end

     0   :  { %16 = vsyncpa [#allocation3], 0  ;;  %s1797_s0 = inlined_call_operand.vmem [shape: bf16[8,8], index: 0, kind: input, shape index: {}]   ;;  %s1798_s1 = inlined_call_operand.hbm [shape: bf16[8,512], index: 1, kind: input, shape index: {}]   ;;  %s1799_s2 = inlined_call_operand.hbm [shape: bf16[1,512], index: 2, kind: input, shape index: {}]   ;;  %s1800_s3 = inlined_call_operand.hbm [shape: bf16[512,256], index: 3, kind: input, shape index: {}]   ;;  %s1801_s4 = inlined_call_operand.vmem [shape: bf16[1,256], index: 4, kind: input, shape index: {}]   ;;  %s1802_s5 = inlined_call_operand.vmem [shape: bf16[256,128], index: 5, kind: input, shape index: {}]   ;;  %s1803_s6 = inlined_call_operand.vmem [shape: bf16[1,128], index: 6, kind: input, shape index: {}]   ;;  %s1804_s7 = inlined_call_operand.vmem [shape: bf16[128,64], index: 7, kind: input, shape index: {}]   ;;  %s1805_s8 = inlined_call_operand.vmem [shape: bf16[1,64], index: 8, kind: input, shape index: {}]   ;;  %s1806_s9 = inlined_call_operand.vmem [shape: bf16[64,2], index: 9, kind: input, shape index: {}]   ;;  %s1807_s10 = inlined_call_operand.vmem [shape: f32[1,2], index: 10, kind: input, shape index: {}]   ;;  %s1808_s11 = inlined_call_operand.vmem [shape: f32[8,2], index: 11, kind: output, shape index: {}]  }
   0x1   :  { %17 = vsyncpa [#allocation5], 0  ;;  %s1532_s17 = smov [#allocation4]   ;;  %s1533_s19 = smov [#allocation2]  }
   0x2   :  { %s36_s18 = sshll.u32 %s1532_s17, 4  ;;  %s26_s20 = sshll.u32 %s1533_s19, 4  ;;  %s37_s18 = int_to_ptr.vmem [resolvable:$true] %s36_s18  ;;  %s27_s20 = int_to_ptr.vmem [resolvable:$true] %s26_s20 }
   0x3   :  { %s1462_s23 = scalar_lea.hbm %s1799_s2, 64 }
   0x4   :  { %p1463_p0 = scmp.ne.s32.totalorder %s1799_s2, %s1462_s23  ;;  %p1466_p1 = scmp.lt.u32.totalorder %s1462_s23, %s1799_s2 }
   0x6   :  { %p1468_p2 = pnand %p1466_p1, %p1463_p0 }
   0x8   :  { %1471 = shalt.err (!%p1468_p2)
}
   0x9   :  { %s1472_s28 = scalar_lea.vmem %s37_s18, 64  ;;  %p1477_p4 = scmp.lt.s32.totalorder %s37_s18, %s37_s18 }
   0xa   :  { %p1473_p3 = scmp.ne.s32.totalorder %s37_s18, %s1472_s28  ;;  %p1478_p5 = scmp.lt.s32.totalorder %s1472_s28, %s1472_s28 }
   0xc   :  { %p1479_p6 = por %p1478_p5, %p1477_p4 }
   0xe   :  { %p1480_p7 = pnand %p1479_p6, %p1473_p3 }
  0x10   :  { %1483 = shalt.err (!%p1480_p7)
}
  0x11   :  { %39 = dma.hbm_to_vmem [thread:$0]  %s1799_s2, 64, %s37_s18, [#allocation5]  }
  0x12   :  { %s1484_s14 = scalar_lea.hbm %s1798_s1, 256 }
  0x13   :  { %p1485_p8 = scmp.ne.s32.totalorder %s1798_s1, %s1484_s14  ;;  %p1488_p9 = scmp.lt.u32.totalorder %s1484_s14, %s1798_s1 }
  0x15   :  { %p1490_p10 = pnand %p1488_p9, %p1485_p8 }
  0x17   :  { %1493 = shalt.err (!%p1490_p10)
}
  0x18   :  { %s1494_s21 = scalar_lea.vmem %s27_s20, 256  ;;  %p1499_p12 = scmp.lt.s32.totalorder %s27_s20, %s27_s20 }
  0x19   :  { %p1495_p11 = scmp.ne.s32.totalorder %s27_s20, %s1494_s21  ;;  %p1500_p13 = scmp.lt.s32.totalorder %s1494_s21, %s1494_s21 }
  0x1b   :  { %p1501_p0 = por %p1500_p13, %p1499_p12 }
  0x1d   :  { %p1502_p1 = pnand %p1501_p0, %p1495_p11 }
  0x1f   :  { %1505 = shalt.err (!%p1502_p1)
}
  0x20   :  { %29 = dma.hbm_to_vmem [thread:$0]  %s1798_s1, 256, %s27_s20, [#allocation3]  }
  0x21   :  { %s1534_s22 = smov [#allocation6]   ;;  %s1506_s26 = scalar_lea.hbm %s1800_s3, 8192 }
  0x22   :  { %s45_s23 = sshll.u32 %s1534_s22, 4  ;;  %p1507_p2 = scmp.ne.s32.totalorder %s1800_s3, %s1506_s26  ;;  %s46_s23 = int_to_ptr.vmem [resolvable:$true] %s45_s23 }
  0x23   :  { %p1510_p3 = scmp.lt.u32.totalorder %s1506_s26, %s1800_s3 }
  0x25   :  { %p1512_p4 = pnand %p1510_p3, %p1507_p2 }
  0x27   :  { %1515 = shalt.err (!%p1512_p4)
}
  0x28   :  { %s1516_s12 = scalar_lea.vmem %s46_s23, 8192  ;;  %p1521_p6 = scmp.lt.s32.totalorder %s46_s23, %s46_s23 }
  0x29   :  { %p1517_p5 = scmp.ne.s32.totalorder %s46_s23, %s1516_s12  ;;  %p1522_p7 = scmp.lt.s32.totalorder %s1516_s12, %s1516_s12 }
  0x2b   :  { %p1523_p8 = por %p1522_p7, %p1521_p6 }
  0x2d   :  { %p1524_p9 = pnand %p1523_p8, %p1517_p5 }
  0x2f   :  { %1527 = shalt.err (!%p1524_p9)
}
  0x30   :  { %s1535_s1 = smov 128   ;;  %s1536_s20 = smov 8  }
  0x31   :  { %51 = dma.hbm_to_vmem [thread:$0]  %s1800_s3, 8192, %s46_s23, [#allocation5], %s1535_s1, %s1535_s1, %s1536_s20  }
  0x32   :  { %1528 = dma.done.wait [#allocation3], 256  }
  0x33   :  { %1529 = vsyncadd [#allocation3], 4294967040 }
  0x34   :  { %1530 = dma.done.wait [#allocation5], 8256  }
  0x35   :  { %1531 = vsyncadd [#allocation5], 4294959040  ;;  %v1537_v0 = vmov 0   ;;  %v77_v1 = vld [vmem:[#allocation2] sm:$0xff]  ;;  %vm93_vm0 = vcmask 1043456   ;;  %v78_v2 = vld [vmem:[#allocation2 + $0x8] sm:$0xff]  ;;  %v205_v57 = vlaneseq }
  0x36   :  { %138 = vmatprep.mubr.bf16.mxu1 %v1537_v0  ;;  %v1150_v3 = vcombine.high %v77_v1, %v77_v1  ;;  %v1149_v4 = vcombine.low %v77_v1, %v77_v1  ;;  %v1152_v5 = vcombine.high %v78_v2, %v78_v2  ;;  %v1151_v6 = vcombine.low %v78_v2, %v78_v2  ;;  %v1338_v7 = vld [vmem:[#allocation6 + $0x4] ss:$8 sps:$4 sm:$0xff]   ;;  %v1340_v8 = vld [vmem:[#allocation6] ss:$8 sps:$4 sm:$0xff]   ;;  %v1341_v10 = vld [vmem:[#allocation6 + $0x14] ss:$8 sps:$4 sm:$0xff]  }
  0x37   :  { %638 = vmatprep.subr.bf16.mxu0 %v1338_v7  ;;  %v76_v11 = vld [vmem:[%s1797_s0] sm:$0xf]  ;;  %vm89_vm1 = vcmask 64512   ;;  %v1343_v13 = vld [vmem:[#allocation6 + $0x10] ss:$8 sps:$4 sm:$0xff]   ;;  %v1438_v47 = vld [vmem:[%s1802_s5 + $0x50] sm:$0xff]  }
  0x38   :  { %1153 = vmatprep.subr.msk.bf16.mxu1 %vm93_vm0, %v1150_v3  ;;  %v95_v9 = vsel %vm93_vm0, %v1149_v4, 0  ;;  %639 = vmatpush1.bf16.msra.mxu0 %v1340_v8  ;;  %v101_v12 = vsel %vm93_vm0, %v1151_v6, 0  ;;  %v1344_v14 = vld [vmem:[#allocation6 + $0x24] ss:$8 sps:$4 sm:$0xff]   ;;  %v1346_v15 = vld [vmem:[#allocation6 + $0x20] ss:$8 sps:$4 sm:$0xff]  }
  0x39   :  { %107 = vmatpush1.bf16.msra.mxu1 %v95_v9  ;;  %640 = vmatprep.subr.bf16.mxu0 %v1341_v10  ;;  %v1347_v16 = vld [vmem:[#allocation6 + $0x34] ss:$8 sps:$4 sm:$0xff]   ;;  %v1349_v17 = vld [vmem:[#allocation6 + $0x30] ss:$8 sps:$4 sm:$0xff]   ;;  %v1350_v18 = vld [vmem:[#allocation6 + $0x44] ss:$8 sps:$4 sm:$0xff]  }
  0x3a   :  { %1155 = vmatprep.subr.msk.bf16.mxu1 %vm93_vm0, %v1152_v5  ;;  %v1352_v19 = vld [vmem:[#allocation6 + $0x40] ss:$8 sps:$4 sm:$0xff]   ;;  %v1353_v20 = vld [vmem:[#allocation6 + $0x54] ss:$8 sps:$4 sm:$0xff]   ;;  %v1355_v21 = vld [vmem:[#allocation6 + $0x50] ss:$8 sps:$4 sm:$0xff]  }
  0x3b   :  { %v1356_v22 = vld [vmem:[#allocation6 + $0x64] ss:$8 sps:$4 sm:$0xff]   ;;  %v1358_v23 = vld [vmem:[#allocation6 + $0x60] ss:$8 sps:$4 sm:$0xff]   ;;  %v1359_v24 = vld [vmem:[#allocation6 + $0x74] ss:$8 sps:$4 sm:$0xff]  }
  0x3c   :  { %1154 = vmatmul.mubr.msk.bf16.vlgmr.msra.gmra.mrb[0].mxu1 %vm89_vm1, %v76_v11  ;;  %641 = vmatpush1.bf16.msra.mxu0 %v1343_v13  ;;  %v1361_v25 = vld [vmem:[#allocation6 + $0x70] ss:$8 sps:$4 sm:$0xff]   ;;  %v1362_v26 = vld [vmem:[#allocation6 + $0x84] ss:$8 sps:$4 sm:$0xff]   ;;  %v1364_v27 = vld [vmem:[#allocation6 + $0x80] ss:$8 sps:$4 sm:$0xff]  }
  0x3d   :  { %148 = vmatpush1.bf16.msra.mxu1 %v101_v12  ;;  %179 = vmatprep.mubr.bf16.mxu1 %v1537_v0  ;;  %v1365_v28 = vld [vmem:[#allocation6 + $0x94] ss:$8 sps:$4 sm:$0xff]   ;;  %v1367_v29 = vld [vmem:[#allocation6 + $0x90] ss:$8 sps:$4 sm:$0xff]   ;;  %v1368_v30 = vld [vmem:[#allocation6 + $0xa4] ss:$8 sps:$4 sm:$0xff]  }
  0x3e   :  { %642 = vmatprep.subr.bf16.mxu0 %v1344_v14  ;;  %v1370_v31 = vld [vmem:[#allocation6 + $0xa0] ss:$8 sps:$4 sm:$0xff]   ;;  %v1371_v32 = vld [vmem:[#allocation6 + $0xb4] ss:$8 sps:$4 sm:$0xff]   ;;  %v1373_v33 = vld [vmem:[#allocation6 + $0xb0] ss:$8 sps:$4 sm:$0xff]  }
  0x3f   :  { %v1374_v34 = vld [vmem:[#allocation6 + $0xc4] ss:$8 sps:$4 sm:$0xff]   ;;  %v1376_v35 = vld [vmem:[#allocation6 + $0xc0] ss:$8 sps:$4 sm:$0xff]   ;;  %v1377_v36 = vld [vmem:[#allocation6 + $0xd4] ss:$8 sps:$4 sm:$0xff]  }
  0x40   :  { %643 = vmatpush1.bf16.msra.mxu0 %v1346_v15  ;;  %v1379_v37 = vld [vmem:[#allocation6 + $0xd0] ss:$8 sps:$4 sm:$0xff]   ;;  %v1380_v38 = vld [vmem:[#allocation6 + $0xe4] ss:$8 sps:$4 sm:$0xff]   ;;  %v1382_v39 = vld [vmem:[#allocation6 + $0xe0] ss:$8 sps:$4 sm:$0xff]  }
  0x41   :  { %644 = vmatprep.subr.bf16.mxu0 %v1347_v16  ;;  %v1383_v40 = vld [vmem:[#allocation6 + $0xf4] ss:$8 sps:$4 sm:$0xff]   ;;  %v1385_v41 = vld [vmem:[#allocation6 + $0xf0] ss:$8 sps:$4 sm:$0xff]   ;;  %v1388_v42 = vld [vmem:[#allocation6 + $0x104] ss:$8 sps:$4 sm:$0xff]  }
  0x42   :  { %v1434_v43 = vld [vmem:[%s1802_s5 + $0x40] sm:$0xff]   ;;  %v1436_v45 = vld [vmem:[%s1802_s5 + $0x48] sm:$0xff]   ;;  %v1439_v48 = vld [vmem:[%s1802_s5 + $0x10] sm:$0xff]   ;;  %v1538_v55 = vmov 1966171168   ;;  %v206_v59 = vshrl.u32 %v205_v57, 7 }
  0x43   :  { %v1435_v44 = vld [vmem:[%s1802_s5] sm:$0xff]   ;;  %1253 = vmatprep.subr.bf16.mxu1 %v1434_v43  ;;  %v1437_v46 = vld [vmem:[%s1802_s5 + $0x8] sm:$0xff]   ;;  %v1440_v49 = vld [vmem:[%s1802_s5 + $0x58] sm:$0xff]   ;;  %v203_v56 = vunpack.c.l.s4 %v1538_v55  ;;  %vm1540_vm2 = vmmov 0   ;;  %vm1097_vm3 = vcmask 523264   ;;  %vm1141_vm4 = vcmask 15360  }
  0x44   :  { %1156 = vmatmul.mubr.msk.bf16.vlgmr.msra.gmra.mrb[4].mxu1 %vm89_vm1, %v76_v11  ;;  %645 = vmatpush1.bf16.msra.mxu0 %v1349_v17  ;;  %v1441_v50 = vld [vmem:[%s1802_s5 + $0x18] sm:$0xff]   ;;  %v1442_v51 = vld [vmem:[%s1802_s5 + $0x60] sm:$0xff]   ;;  %v1444_v53 = vld [vmem:[%s1802_s5 + $0x68] sm:$0xff]   ;;  %v1692_v3 = vsub.s32 0, %v206_v59 }
  0x45   :  { %646 = vmatprep.subr.bf16.mxu0 %v1350_v18  ;;  %1254 = vmatpush3.bf16.msra.mxu1 %v1435_v44  ;;  %v1443_v52 = vld [vmem:[%s1802_s5 + $0x20] sm:$0xff]   ;;  %v1445_v54 = vld [vmem:[%s1802_s5 + $0x28] sm:$0xff]   ;;  %v204_v58 = vunpack.c.0.s8 %v203_v56  ;;  %v1157_v60 = vld.sshfl [vmem:[#allocation4] sm:$0x33 pattern:$0x75316420] }
  0x46   :  { %1255 = vmatprep.subr.bf16.mxu1 %v1436_v45  ;;  %v201_v62 = vcombine.high %v1157_v60, %v1157_v60  ;;  %v1386_v18 = vld [vmem:[#allocation6 + $0x100] ss:$8 sps:$4 sm:$0xff]   ;;  %v1415_v44 = vld [vmem:[#allocation6 + $0x194] ss:$8 sps:$4 sm:$0xff]   ;;  %v1413_v45 = vld [vmem:[#allocation6 + $0x190] ss:$8 sps:$4 sm:$0xff]  }
  0x47   :  { %v1684_v61 = vsub.s32 %v204_v58, %v206_v59  ;;  %v1410_v43 = vld [vmem:[#allocation6 + $0x180] ss:$8 sps:$4 sm:$0xff]   ;;  %v1430_v56 = vld [vmem:[#allocation6 + $0x1e4] ss:$8 sps:$4 sm:$0xff]  }
  0x48   :  { %647 = vmatpush1.bf16.msra.mxu0 %v1352_v19  ;;  %v1428_v57 = vld [vmem:[#allocation6 + $0x1e0] ss:$8 sps:$4 sm:$0xff]  }
  0x49   :  { %648 = vmatprep.subr.bf16.mxu0 %v1353_v20  ;;  %1256 = vmatpush3.bf16.msra.mxu1 %v1437_v46  ;;  %v1687_v63 = vrot.slane %v1157_v60, %v1684_v61  ;;  %v215_v1 = vrot.slane %v201_v62, %v1684_v61  ;;  %v1391_v20 = vld [vmem:[#allocation6 + $0x114] ss:$8 sps:$4 sm:$0xff]   ;;  %v1418_v46 = vld [vmem:[#allocation6 + $0x1a4] ss:$8 sps:$4 sm:$0xff]   ;;  %v1431_v62 = vld [vmem:[#allocation6 + $0x1f0] ss:$8 sps:$4 sm:$0xff]  }
  0x4a   :  { %1257 = vmatprep.subr.bf16.mxu1 %v1438_v47  ;;  %v1416_v47 = vld [vmem:[#allocation6 + $0x1a0] ss:$8 sps:$4 sm:$0xff]   ;;  %v1433_v60 = vld [vmem:[#allocation6 + $0x1f4] ss:$8 sps:$4 sm:$0xff]  }
  0x4b   :  { %v219_v2 = vpack.i.b16 %v1687_v63, %v1687_v63  ;;  %v226_v4 = vpack.i.b16 %v215_v1, %v215_v1  ;;  %v217_v8 = vcombine.high %v215_v1, %v215_v1 }
  0x4c   :  { %649 = vmatpush1.bf16.msra.mxu0 %v1355_v21 }
  0x4d   :  { %650 = vmatprep.subr.bf16.mxu0 %v1356_v22  ;;  %1258 = vmatpush3.bf16.msra.mxu1 %v1439_v48  ;;  %v224_v5 = vrot.slane %v219_v2, %v1692_v3  ;;  %v231_v7 = vrot.slane %v226_v4, %v1692_v3  ;;  %v240_v16 = vpack.i.b16 %v217_v8, %v217_v8  ;;  %v1421_v48 = vld [vmem:[#allocation6 + $0x1b4] ss:$8 sps:$4 sm:$0xff]   ;;  %v1222_v8 = vld.sshfl [vmem:[%s1801_s4] sm:$0x11 pattern:$0x75316420] }
  0x4e   :  { %1259 = vmatprep.subr.bf16.mxu1 %v1440_v49  ;;  %v1419_v49 = vld [vmem:[#allocation6 + $0x1b0] ss:$8 sps:$4 sm:$0xff]   ;;  %v1446_v2 = vld [vmem:[%s1802_s5 + $0x70] sm:$0xff]  }
  0x4f   :  { %v245_v22 = vrot.slane %v240_v16, %v1692_v3  ;;  %v1447_v4 = vld [vmem:[%s1802_s5 + $0x30] sm:$0xff]  }
  0x50   :  { %651 = vmatpush1.bf16.msra.mxu0 %v1358_v23 }
  0x51   :  { %652 = vmatprep.subr.bf16.mxu0 %v1359_v24  ;;  %1260 = vmatpush3.bf16.msra.mxu1 %v1441_v50  ;;  %v1389_v24 = vld [vmem:[#allocation6 + $0x110] ss:$8 sps:$4 sm:$0xff]   ;;  %v1424_v50 = vld [vmem:[#allocation6 + $0x1c4] ss:$8 sps:$4 sm:$0xff]  }
  0x52   :  { %1261 = vmatprep.subr.bf16.mxu1 %v1442_v51  ;;  %v1422_v51 = vld [vmem:[#allocation6 + $0x1c0] ss:$8 sps:$4 sm:$0xff]  }
  0x54   :  { %653 = vmatpush1.bf16.msra.mxu0 %v1361_v25 }
  0x55   :  { %654 = vmatprep.subr.bf16.mxu0 %v1362_v26  ;;  %1262 = vmatpush3.bf16.msra.mxu1 %v1443_v52  ;;  %v216_v52 = vcombine.high %v1687_v63, %v1687_v63 }
  0x56   :  { %1263 = vmatprep.subr.bf16.mxu1 %v1444_v53  ;;  %v1427_v53 = vld [vmem:[#allocation6 + $0x1d4] ss:$8 sps:$4 sm:$0xff]  }
  0x57   :  { %v233_v55 = vpack.i.b16 %v216_v52, %v216_v52 }
  0x58   :  { %655 = vmatpush1.bf16.msra.mxu0 %v1364_v27  ;;  %v1394_v27 = vld [vmem:[#allocation6 + $0x124] ss:$8 sps:$4 sm:$0xff]  }
  0x59   :  { %656 = vmatprep.subr.bf16.mxu0 %v1365_v28  ;;  %1264 = vmatpush3.bf16.msra.mxu1 %v1445_v54  ;;  %v1425_v54 = vld [vmem:[#allocation6 + $0x1d0] ss:$8 sps:$4 sm:$0xff]   ;;  %v238_v59 = vrot.slane %v233_v55, %v1692_v3 }
  0x5a   :  { %1265 = vmatprep.subr.bf16.mxu1 %v1446_v2 }
  0x5c   :  { %657 = vmatpush1.bf16.msra.mxu0 %v1367_v29 }
  0x5d   :  { %658 = vmatprep.subr.bf16.mxu0 %v1368_v30  ;;  %v1392_v30 = vld [vmem:[#allocation6 + $0x120] ss:$8 sps:$4 sm:$0xff]   ;;  %1266 = vmatpush3.bf16.msra.mxu1 %v1447_v4 }
  0x60   :  { %659 = vmatpush1.bf16.msra.mxu0 %v1370_v31 }
  0x61   :  { %660 = vmatprep.subr.bf16.mxu0 %v1371_v32  ;;  %v1397_v32 = vld [vmem:[#allocation6 + $0x134] ss:$8 sps:$4 sm:$0xff]  }
  0x64   :  { %661 = vmatpush1.bf16.msra.mxu0 %v1373_v33  ;;  %v1395_v33 = vld [vmem:[#allocation6 + $0x130] ss:$8 sps:$4 sm:$0xff]  }
  0x65   :  { %662 = vmatprep.subr.bf16.mxu0 %v1374_v34  ;;  %v1400_v34 = vld [vmem:[#allocation6 + $0x144] ss:$8 sps:$4 sm:$0xff]  }
  0x68   :  { %663 = vmatpush1.bf16.msra.mxu0 %v1376_v35  ;;  %v1398_v35 = vld [vmem:[#allocation6 + $0x140] ss:$8 sps:$4 sm:$0xff]  }
  0x69   :  { %664 = vmatprep.subr.bf16.mxu0 %v1377_v36  ;;  %v1403_v36 = vld [vmem:[#allocation6 + $0x154] ss:$8 sps:$4 sm:$0xff]  }
  0x6c   :  { %665 = vmatpush1.bf16.msra.mxu0 %v1379_v37  ;;  %v1401_v37 = vld [vmem:[#allocation6 + $0x150] ss:$8 sps:$4 sm:$0xff]  }
  0x6d   :  { %666 = vmatprep.subr.bf16.mxu0 %v1380_v38  ;;  %v1406_v38 = vld [vmem:[#allocation6 + $0x164] ss:$8 sps:$4 sm:$0xff]  }
  0x70   :  { %667 = vmatpush1.bf16.msra.mxu0 %v1382_v39  ;;  %v1404_v39 = vld [vmem:[#allocation6 + $0x160] ss:$8 sps:$4 sm:$0xff]  }
  0x71   :  { %668 = vmatprep.subr.bf16.mxu0 %v1383_v40  ;;  %v1409_v40 = vld [vmem:[#allocation6 + $0x174] ss:$8 sps:$4 sm:$0xff]  }
  0x74   :  { %669 = vmatpush1.bf16.msra.mxu0 %v1385_v41  ;;  %v1407_v41 = vld [vmem:[#allocation6 + $0x170] ss:$8 sps:$4 sm:$0xff]  }
  0x75   :  { %679 = vmatprep.subr.bf16.mxu0 %v1388_v42  ;;  %v1412_v42 = vld [vmem:[#allocation6 + $0x184] ss:$8 sps:$4 sm:$0xff]  }
 0x10f   :  { %v140_v6 = vpop.f32.mrb[0].mxu1 }
 0x110   :  { %v188_v9 = vpack.c.bf16 %v140_v6, %v140_v6  ;;  %v142_v10 = vpop.f32.mrb[1].mxu1  ;;  %v1449_v6 = vld [vmem:[%s1802_s5 + $0x38] sm:$0xff]  }
 0x111   :  { %v189_v11 = vpack.c.bf16 %v142_v10, %v142_v10  ;;  %v144_v12 = vpop.f32.mrb[2].mxu1  ;;  %v738_v10 = vrot.slane %v1222_v8, %v1684_v61 }
 0x112   :  { %v246_v13 = vadd.bf16 %v224_v5, %v188_v9  ;;  %v145_v14 = vpop.f32.mrb[3].mxu1  ;;  %v1448_v5 = vld [vmem:[%s1802_s5 + $0x78] sm:$0xff]   ;;  %v731_v9 = vcombine.high %v1222_v8, %v1222_v8 }
 0x113   :  { %v247_v15 = vadd.bf16 %v231_v7, %v189_v11  ;;  %1267 = vmatprep.subr.bf16.mxu1 %v1448_v5  ;;  %v1539_v7 = vmov 0.0   ;;  %v747_v12 = vpack.i.b16 %v738_v10, %v738_v10 }
 0x114   :  { %v250_v19 = vmax.bf16 %v1537_v0, %v246_v13  ;;  %1268 = vmatpush3.bf16.msra.mxu1 %v1449_v6  ;;  %v745_v11 = vrot.slane %v731_v9, %v1684_v61  ;;  %v1450_v61 = vld [vmem:[%s1804_s7] sm:$0xff]  }
 0x115   :  { %v251_v17 = vmax.bf16 %v1537_v0, %v247_v15  ;;  %1289 = vmatprep.subr.bf16.mxu1 %v1539_v7  ;;  %v752_v14 = vrot.slane %v747_v12, %v1692_v3 }
 0x116   :  { %v754_v13 = vpack.i.b16 %v745_v11, %v745_v11 }
 0x117   :  { %670 = vmatprep.mubr.bf16.mxu0 %v251_v17  ;;  %v1698_v21 = vpop.f32.mrb[4].mxu1 }
 0x118   :  { %671 = vmatmul.mubr.bf16.vlgmr.msra.gmra.mrb[0].mxu0 %v250_v19  ;;  %v183_v23 = vpop.f32.mrb[5].mxu1  ;;  %v190_v58 = vpack.c.bf16 %v1698_v21, %v1698_v21  ;;  %v759_v16 = vrot.slane %v754_v13, %v1692_v3 }
 0x119   :  { %680 = vmatpush1.bf16.msra.mxu0 %v1386_v18  ;;  %v191_v25 = vpack.c.bf16 %v183_v23, %v183_v23  ;;  %v185_v26 = vpop.f32.mrb[6].mxu1 }
 0x11a   :  { %681 = vmatprep.subr.bf16.mxu0 %v1391_v20  ;;  %v186_v28 = vpop.f32.mrb[7].mxu1  ;;  %v248_v1 = vadd.bf16 %v238_v59, %v190_v58  ;;  %v1451_v26 = vld [vmem:[%s1804_s7 + $0x8] sm:$0xff]   ;;  %v1247_v58 = vld [vmem:[%s1807_s10] ss:$0 sm:$0xff] }
 0x11b   :  { %v249_v29 = vadd.bf16 %v245_v22, %v191_v25  ;;  %v1453_v28 = vld [vmem:[%s1804_s7 + $0x18] sm:$0xff]  }
 0x11c   :  { %v252_v63 = vmax.bf16 %v1537_v0, %v248_v1 }
 0x11d   :  { %682 = vmatpush1.bf16.msra.mxu0 %v1389_v24  ;;  %v253_v31 = vmax.bf16 %v1537_v0, %v249_v29  ;;  %v1454_v29 = vld [vmem:[%s1804_s7 + $0x20] sm:$0xff]  }
 0x11e   :  { %683 = vmatprep.subr.bf16.mxu0 %v1394_v27  ;;  %v1452_v27 = vld [vmem:[%s1804_s7 + $0x10] sm:$0xff]  }
 0x11f   :  { %711 = vmatprep.mubr.bf16.mxu0 %v253_v31  ;;  %v1456_v31 = vld [vmem:[%s1804_s7 + $0x30] sm:$0xff]  }
 0x121   :  { %684 = vmatpush1.bf16.msra.mxu0 %v1392_v30  ;;  %v1455_v30 = vld [vmem:[%s1804_s7 + $0x28] sm:$0xff]  }
 0x122   :  { %685 = vmatprep.subr.bf16.mxu0 %v1397_v32  ;;  %v1457_v32 = vld [vmem:[%s1804_s7 + $0x38] sm:$0xff]  }
 0x125   :  { %686 = vmatpush1.bf16.msra.mxu0 %v1395_v33  ;;  %v933_v33 = vld [vmem:[%s1803_s6] sm:$0x1] }
 0x126   :  { %687 = vmatprep.subr.bf16.mxu0 %v1400_v34  ;;  %v935_v34 = vpack.i.b16 %v933_v33, %v933_v33 }
 0x129   :  { %688 = vmatpush1.bf16.msra.mxu0 %v1398_v35 }
 0x12a   :  { %689 = vmatprep.subr.bf16.mxu0 %v1403_v36 }
 0x12d   :  { %690 = vmatpush1.bf16.msra.mxu0 %v1401_v37 }
 0x12e   :  { %691 = vmatprep.subr.bf16.mxu0 %v1406_v38  ;;  %v940_v38 = vrot.slane %v935_v34, %v1692_v3 }
 0x131   :  { %692 = vmatpush1.bf16.msra.mxu0 %v1404_v39 }
 0x132   :  { %693 = vmatprep.subr.bf16.mxu0 %v1409_v40 }
 0x135   :  { %694 = vmatpush1.bf16.msra.mxu0 %v1407_v41 }
 0x136   :  { %695 = vmatprep.subr.bf16.mxu0 %v1412_v42 }
 0x139   :  { %696 = vmatpush1.bf16.msra.mxu0 %v1410_v43  ;;  %v1458_v43 = vld [vmem:[%s1806_s9] sm:$0xff]  }
 0x13a   :  { %697 = vmatprep.subr.bf16.mxu0 %v1415_v44 }
 0x13d   :  { %698 = vmatpush1.bf16.msra.mxu0 %v1413_v45  ;;  %v1459_v45 = vld [vmem:[%s1806_s9 + $0x8] sm:$0xff]  }
 0x13e   :  { %699 = vmatprep.subr.bf16.mxu0 %v1418_v46  ;;  %v1460_v46 = vld [vmem:[%s1806_s9 + $0x10] sm:$0xff]  }
 0x141   :  { %700 = vmatpush1.bf16.msra.mxu0 %v1416_v47  ;;  %v1461_v47 = vld [vmem:[%s1806_s9 + $0x18] sm:$0xff]  }
 0x142   :  { %701 = vmatprep.subr.bf16.mxu0 %v1421_v48  ;;  %v1048_v48 = vld [vmem:[%s1805_s8] sm:$0x1] }
 0x145   :  { %702 = vmatpush1.bf16.msra.mxu0 %v1419_v49  ;;  %v1050_v49 = vpack.i.b16 %v1048_v48, %v1048_v48 }
 0x146   :  { %703 = vmatprep.subr.bf16.mxu0 %v1424_v50 }
 0x147   :  { %v1055_v50 = vrot.slane %v1050_v49, %v1692_v3 }
 0x149   :  { %704 = vmatpush1.bf16.msra.mxu0 %v1422_v51 }
 0x14a   :  { %705 = vmatprep.subr.bf16.mxu0 %v1427_v53 }
 0x14d   :  { %706 = vmatpush1.bf16.msra.mxu0 %v1425_v54 }
 0x14e   :  { %707 = vmatprep.subr.bf16.mxu0 %v1430_v56 }
 0x151   :  { %708 = vmatpush1.bf16.msra.mxu0 %v1428_v57 }
 0x152   :  { %709 = vmatprep.subr.bf16.mxu0 %v1433_v60 }
 0x155   :  { %710 = vmatpush1.bf16.msra.mxu0 %v1431_v62 }
 0x158   :  { %712 = vmatmul.mubr.bf16.vlgmr.msra.gmra.mrb[0].mxu0 %v252_v63 }
 0x22b   :  { %v713_v15 = vpop.f32.mrb[0].mxu0 }
 0x22c   :  { %v720_v17 = vpack.c.bf16 %v713_v15, %v713_v15  ;;  %v715_v18 = vpop.f32.mrb[1].mxu0 }
 0x22d   :  { %v721_v19 = vpack.c.bf16 %v715_v18, %v715_v18  ;;  %v717_v20 = vpop.f32.mrb[2].mxu0 }
 0x22e   :  { %v760_v21 = vadd.bf16 %v752_v14, %v720_v17  ;;  %v718_v22 = vpop.f32.mrb[3].mxu0 }
 0x22f   :  { %v761_v23 = vadd.bf16 %v759_v16, %v721_v19 }
 0x230   :  { %v762_v25 = vmax.bf16 %v1537_v0, %v760_v21 }
 0x231   :  { %v763_v24 = vmax.bf16 %v1537_v0, %v761_v23 }
 0x233   :  { %924 = vmatprep.mubr.bf16.mxu1 %v763_v24 }
 0x234   :  { %925 = vmatmul.mubr.bf16.vlgmr.msra.gmra.mrb[8].mxu1 %v762_v25 }
 0x235   :  { %1290 = vmatpush3.bf16.msra.mxu1 %v1450_v61  ;;  %1305 = vmatprep.mubr.msk.bf16.mxu1 %vm1540_vm2, %v1539_v7 }
 0x236   :  { %1291 = vmatprep.subr.bf16.mxu1 %v1539_v7 }
 0x239   :  { %1292 = vmatpush3.bf16.msra.mxu1 %v1451_v26 }
 0x23a   :  { %1293 = vmatprep.subr.bf16.mxu1 %v1539_v7 }
 0x23d   :  { %1294 = vmatpush3.bf16.msra.mxu1 %v1452_v27 }
 0x23e   :  { %1295 = vmatprep.subr.bf16.mxu1 %v1539_v7 }
 0x241   :  { %1296 = vmatpush3.bf16.msra.mxu1 %v1453_v28 }
 0x242   :  { %1297 = vmatprep.subr.bf16.mxu1 %v1539_v7 }
 0x245   :  { %1298 = vmatpush3.bf16.msra.mxu1 %v1454_v29 }
 0x246   :  { %1299 = vmatprep.subr.bf16.mxu1 %v1539_v7 }
 0x249   :  { %1300 = vmatpush3.bf16.msra.mxu1 %v1455_v30 }
 0x24a   :  { %1301 = vmatprep.subr.bf16.mxu1 %v1539_v7 }
 0x24d   :  { %1302 = vmatpush3.bf16.msra.mxu1 %v1456_v31 }
 0x24e   :  { %1303 = vmatprep.subr.bf16.mxu1 %v1539_v7 }
 0x251   :  { %1304 = vmatpush3.bf16.msra.mxu1 %v1457_v32 }
 0x252   :  { %1309 = vmatprep.subr.bf16.mxu1 %v1539_v7 }
 0x307   :  { %v1269_v35 = vpop.f32.mrb[8].mxu1 }
 0x308   :  { %v1270_v36 = vpop.f32.mrb[9].mxu1 }
 0x309   :  { %v1271_v37 = vadd.f32 %v1270_v36, %v1269_v35  ;;  %v1272_v39 = vpop.f32.mrb[10].mxu1 }
 0x30a   :  { %v1273_v40 = vpop.f32.mrb[11].mxu1 }
 0x30b   :  { %v932_v41 = vpack.c.bf16 %v1271_v37, %v1271_v37 }
 0x30d   :  { %v941_v42 = vadd.bf16 %v940_v38, %v932_v41 }
 0x30f   :  { %v942_v44 = vmax.bf16 %v1537_v0, %v941_v42 }
 0x311   :  { %1306 = vmatmul.mubr.bf16.vlgmr.msra.gmra.mrb[12].mxu1 %v942_v44 }
 0x312   :  { %1310 = vmatpush3.bf16.msra.mxu1 %v1458_v43  ;;  %1317 = vmatprep.mubr.msk.bf16.mxu1 %vm1540_vm2, %v1539_v7 }
 0x313   :  { %1311 = vmatprep.subr.bf16.mxu1 %v1539_v7 }
 0x316   :  { %1312 = vmatpush3.bf16.msra.mxu1 %v1459_v45 }
 0x317   :  { %1313 = vmatprep.subr.bf16.mxu1 %v1539_v7 }
 0x31a   :  { %1314 = vmatpush3.bf16.msra.mxu1 %v1460_v46 }
 0x31b   :  { %1315 = vmatprep.subr.bf16.mxu1 %v1539_v7 }
 0x31e   :  { %1316 = vmatpush3.bf16.msra.mxu1 %v1461_v47 }
 0x3e4   :  { %v1041_v51 = vpop.f32.mrb[12].mxu1 }
 0x3e5   :  { %v1047_v52 = vpack.c.bf16 %v1041_v51, %v1041_v51  ;;  %v1307_v53 = vpop.f32.mrb[13].mxu1 }
 0x3e6   :  { %v1044_v54 = vpop.f32.mrb[14].mxu1 }
 0x3e7   :  { %v1056_v55 = vadd.bf16 %v1055_v50, %v1047_v52  ;;  %v1308_v56 = vpop.f32.mrb[15].mxu1 }
 0x3e9   :  { %v1057_v57 = vmax.bf16 %v1537_v0, %v1056_v55 }
 0x3eb   :  { %1318 = vmatmul.mubr.msk.bf16.vlgmr.msra.gmra.mrb[16].mxu1 %vm1097_vm3, %v1057_v57 }
 0x4be   :  { %v1135_v59 = vpop.f32.mrb[16].mxu1 }
 0x4bf   :  { %v1136_v60 = vadd.f32 %v1247_v58, %v1135_v59  ;;  %v1319_v62 = vpop.f32.mrb[17].mxu1 }
 0x4c0   :  { %v1138_v1 = vpop.f32.mrb[18].mxu1 }
 0x4c1   :  { %1142 = vst.msk [vmem:[%s1808_s11] sm:$0xff] %vm1141_vm4, %v1136_v60  ;;  %v1320_v3 = vpop.f32.mrb[19].mxu1 }
 0x4c2   :  { %1147 = vsyncpa [#allocation3], 1 }
 0x4c3   :  { %1148 = vsyncpa [#allocation5], 1 }

</bundles_post_ra>
